<compile_context>
chip_gen: v7x
topology: tpu7x:2x2x1
jax: 0.10.0
libtpu: 0.0.40
codegen_flags: <defaults>
</compile_context>

<pallas_src>
import jax
import jax.numpy as jnp
from jax.experimental import pallas as pl
from jax.experimental.pallas import tpu as pltpu


# -------------------------- Pallas kernel --------------------------------- #

def _layer_scale_kernel(x_ref, g_ref, o_ref):
    # x_ref: (bm, D) tile.  g_ref: (1, D) f32 gamma row (resident, broadcast
    # over rows).  Multiply in f32, cast only on the store.
    x = x_ref[...].astype(jnp.float32)
    o_ref[...] = (x * g_ref[...]).astype(o_ref.dtype)


# -------------------------- wrapper ---------------------------------------- #

def _round_up(x, m):
    return ((x + m - 1) // m) * m


def layer_scale(x, gamma, *, block_rows=None):
    """x: (..., dim).  gamma: scalar or any shape with `dim` elements (e.g. the
    nn.Parameter of shape (1, 1, dim)).  Returns x * gamma, same shape/dtype
    as x."""
    orig_shape = x.shape
    D = orig_shape[-1]
    x2 = x.reshape(-1, D)                        # lane-dense: dim on lanes
    R = x2.shape[0]

    # Gamma in f32, shaped (1, D).  Accept scalar or per-channel parameters.
    g = jnp.asarray(gamma, dtype=jnp.float32)
    if g.size == D:
        g2 = g.reshape(1, D)
    else:
        g2 = jnp.broadcast_to(g.reshape(-1), (D,)).reshape(1, D)

    itemsize = jnp.dtype(x.dtype).itemsize
    # Dtype-native sublane tile: 8 for f32, 16 for bf16, 32 for int8/fp8.
    sub = max(8, 32 // itemsize)

    # ~20 MiB budget for the 4 double-buffered in/out tiles -> ~5 MiB tiles.
    # vmem_limit_bytes is set explicitly (32 MiB) so this also compiles on
    # v5e (16 MiB scoped default) and stays inside v7x's 64 MiB physical VMEM.
    vmem_budget = 20 * 1024 * 1024
    vmem_limit = 32 * 1024 * 1024
    max_rows = max(sub, (vmem_budget // (4 * D * itemsize)) // sub * sub)

    if R <= sub:
        # Tiny input: one full block (block dim equals the full array dim).
        bm = R
    elif block_rows is not None:
        bm = max(sub, min(_round_up(block_rows, sub), max_rows))
    else:
        # Never run as a single grid step: aim for >= MIN_STEPS blocks so the
        # pipeline overlaps reads and writes and both v7x TCs get work.
        MIN_STEPS = 8
        bm = min(max_rows, _round_up(pl.cdiv(R, MIN_STEPS), sub))
        bm = max(sub, bm)
        nb = pl.cdiv(R, bm)
        if nb > 1 and nb % 2 == 1:               # even block count for 2 TCs
            bm = max(sub, _round_up(pl.cdiv(R, nb + 1), sub))

    grid = (pl.cdiv(R, bm),)

    out = pl.pallas_call(
        _layer_scale_kernel,
        out_shape=jax.ShapeDtypeStruct((R, D), x.dtype),
        grid=grid,
        in_specs=[
            pl.BlockSpec((bm, D), lambda i: (i, 0)),   # x row tile
            pl.BlockSpec((1, D), lambda i: (0, 0)),    # gamma, resident
        ],
        out_specs=pl.BlockSpec((bm, D), lambda i: (i, 0)),
        compiler_params=pltpu.CompilerParams(
            dimension_semantics=("parallel",),         # independent row tiles
            vmem_limit_bytes=vmem_limit),
        cost_estimate=pl.CostEstimate(
            flops=R * D,
            transcendentals=0,
            bytes_accessed=2 * x.size * itemsize + D * 4),
    )(x2, g2)
    return out.reshape(orig_shape)


# -------------------------- pure-JAX reference ----------------------------- #

def layer_scale_ref(x, gamma):
    return (x.astype(jnp.float32) * jnp.asarray(gamma, jnp.float32)).astype(x.dtype)


# -------------------------- main ------------------------------------------- #

if __name__ == "__main__":
    key = jax.random.PRNGKey(0)

    # Small but lane-friendly shapes: (batch, tokens, hidden), hidden a
    # multiple of 128 so every vreg load/store is full-width.
    B, N, D = 2, 128, 256
    x = jax.random.normal(key, (B, N, D), dtype=jnp.float32)

    # Module init: gamma = init_values * ones(1, 1, dim)
    init_values = 1e-5
    gamma = init_values * jnp.ones((1, 1, D), dtype=jnp.float32)

    # Default heuristic: R=256 rows -> bm=32, grid=(8,), exercising the
    # multi-step / even-block pipeline path.
    out = layer_scale(x, gamma)
    out = jax.block_until_ready(out)

    ref = layer_scale_ref(x, gamma)
    assert out.shape == x.shape and out.dtype == x.dtype
    if not jnp.allclose(out, ref, rtol=1e-6, atol=1e-6):
        raise AssertionError("Pallas kernel does not match JAX reference")
    print("KERNEL_OK")
</pallas_src>

<mosaic_0001>
module attributes {stable_mosaic.version = 11 : i64} {
  func.func @_layer_scale_kernel(%arg0: i32, %arg1: memref<32x256xf32, #tpu.memory_space<vmem>>, %arg2: memref<1x256xf32, #tpu.memory_space<vmem>>, %arg3: memref<32x256xf32, #tpu.memory_space<vmem>>) attributes {dimension_semantics = [#tpu.dimension_semantics<parallel>], iteration_bounds = array<i64: 8>, scalar_prefetch = 0 : i64, scratch_operands = 0 : i64, tpu.core_type = #tpu.core_type<tc>, window_params = [{transform_indices = @transform_0, window_bounds = array<i64: 32, 256>}, {pipeline_mode = #tpu.pipeline_mode<synchronous>, transform_indices = @transform_1, window_bounds = array<i64: 1, 256>}, {transform_indices = @transform_2, window_bounds = array<i64: 32, 256>}]} {
    %c0 = arith.constant 0 : index
    %c0_0 = arith.constant 0 : index
    %0 = vector.load %arg1[%c0, %c0_0] : memref<32x256xf32, #tpu.memory_space<vmem>>, vector<32x256xf32>
    %c0_1 = arith.constant 0 : index
    %c0_2 = arith.constant 0 : index
    %1 = vector.load %arg2[%c0_1, %c0_2] : memref<1x256xf32, #tpu.memory_space<vmem>>, vector<1x256xf32>
    %2 = vector.broadcast %1 : vector<1x256xf32> to vector<32x256xf32>
    %3 = arith.mulf %0, %2 : vector<32x256xf32>
    %c0_3 = arith.constant 0 : index
    %c0_4 = arith.constant 0 : index
    %4 = vector.load %arg3[%c0_3, %c0_4] : memref<32x256xf32, #tpu.memory_space<vmem>>, vector<32x256xf32>
    tpu.vector_store %arg3[%c0_3, %c0_4], %3 {strides = array<i32>} : memref<32x256xf32, #tpu.memory_space<vmem>>, vector<32x256xf32>,
    return
  }
  func.func @transform_0(%arg0: i32) -> (i32, i32) {
    %c0_i32 = arith.constant 0 : i32
    %c0_i32_0 = arith.constant 0 : i32
    return %arg0, %c0_i32 : i32, i32
  }
  func.func @transform_1(%arg0: i32) -> (i32, i32) {
    %c0_i32 = arith.constant 0 : i32
    %c0_i32_0 = arith.constant 0 : i32
    %c0_i32_1 = arith.constant 0 : i32
    return %c0_i32, %c0_i32_0 : i32, i32
  }
  func.func @transform_2(%arg0: i32) -> (i32, i32) {
    %c0_i32 = arith.constant 0 : i32
    %c0_i32_0 = arith.constant 0 : i32
    return %arg0, %c0_i32 : i32, i32
  }
}

</mosaic_0001>

<bundles_post_ra>
// kernel: tpu_custom_call.1
= control target key start
LH: loop header
LB: loop body
LE: loop exit
PB: predicated region body
PF: predicated region fallthrough
CT: control target
= control target key end

     0   :  { %7 = vsyncpa [#allocation3], 0  ;;  %s641_s0 = inlined_call_operand.hbm [shape: f32[256,256], index: 0, kind: input, shape index: {}]   ;;  %s642_s1 = inlined_call_operand.vmem [shape: f32[1,256], index: 1, kind: input, shape index: {}]   ;;  %s643_s2 = inlined_call_operand.hbm [shape: f32[256,256], index: 2, kind: output, shape index: {}]  }
   0x1   :  { %9 = vsyncpa [#allocation3 + $0x1], 0 }
   0x2   :  { %10 = vsyncpa [#allocation4], 0 }
   0x3   :  { %12 = vsyncpa [#allocation4 + $0x1], 0  ;;  %s478_s9 = smov 0   ;;  %s480_s10 = smov 0  }
   0x4   :  { %s482_s11 = smov 0   ;;  %s484_s12 = smov 0  }
   0x5 LB: > { %s499_s13 = sadd.s32 4294967295, %s455_s12   ;;  %s289_s14 = sadd.s32 4294967294, %s455_s12   ;;  %s455_s12 = sphi %s484_s12, %s655_s12   ;;  %s451_s11 = sphi %s482_s11, %s654_s11   ;;  %s447_s10 = sphi %s480_s10, %s653_s10   ;;  %s443_s9 = sphi %s478_s9, %s652_s9  }
   0x6   : > { %s503_s15 = sadd.s32 1, %s455_s12   ;;  %s25_s16 = sadd.s32 1, %s451_s11 }
   0x7   : > { %s22_s17 = ssub.s32 %s455_s12, %s503_s15  ;;  %p32_p0 = scmp.ne.s32.totalorder %s451_s11, %s447_s10 }
   0x8   : > { %p23_p1 = scmp.eq.s32.totalorder %s22_s17, 0  ;;  %p33_p2 = scmp.eq.s32.totalorder %s455_s12, 0 }
   0x9   : > { %p38_p3 = scmp.ne.s32.totalorder %s447_s10, %s443_s9  ;;  %p39_p4 = scmp.eq.s32.totalorder %s499_s13, 0 }
   0xa   : > { %s515_s18 = scalar_select %p23_p1, %s451_s11, %s25_s16  }
   0xb   : > { %p517_p5 = por %p33_p2, %p32_p0  ;;  %p521_p6 = por %p39_p4, %p38_p3 }
   0xc   : > { %p83_p7 = scmp.eq.s32.totalorder %s499_s13, 7  ;;  %p89_p8 = scmp.eq.s32.totalorder %s289_s14, 7 }
   0xd   : > { %p321_p9 = scmp.lt.s32.totalorder %s455_s12, 8  ;;  %s112_s23 = sand.u32 1, %s451_s11  }
   0xe   : > { %p527_p10 = por %p83_p7, %p32_p0  ;;  %p531_p11 = por %p89_p8, %p38_p3 }
   0xf   : > { %s306_s24 = sshll.u32 %s455_s12, 10  ;;  %s292_s25 = sshll.u32 %s112_s23, 6 }
  0x10   : > { %s647_s21 = scalar_select %p527_p10, 1, 0 }
  0x11   : > { %s648_s22 = scalar_select %p531_p11, 1, 0 }
  0x12   : > { %s540_s28 = scalar_lea.hbm %s641_s0, %s306_s24  ;;  %s116_s29 = scalar_lea.vmem [#allocation2], %s292_s25 }
  0x13   : > { %s124_s30 = sshll.u32 %s116_s29, 4  ;;  %p544_p12 = pnand %p321_p9, %p517_p5  ;;  %s548_s30 = int_to_ptr.vmem [resolvable:$true] %s124_s30 }
  0x14   : > { %s550_s4 = scalar_lea.sflag [#allocation3], %s112_s23  ;;  %s359_s5 = scalar_lea.hbm %s540_s28, 1024 }
  0x15   : > { %p360_p13 = scmp.ne.s32.totalorder %s540_s28, %s359_s5  ;;  %p361_p0 = pneg %p544_p12 }
  0x16   : > { %s364_s8 = scalar_lea.hbm %s641_s0, 8192  ;;  %p365_p3 = scmp.lt.u32.totalorder %s540_s28, %s641_s0 }
  0x17   : > { %p362_p1 = pnand %p361_p0, %p360_p13  ;;  %p366_p4 = scmp.lt.u32.totalorder %s364_s8, %s359_s5 }
  0x18   : > { %p368_p7 = scmp.lt.u32.totalorder %s359_s5, %s540_s28 }
  0x19   : > { %p363_p2 = pneg %p362_p1  ;;  %p367_p5 = por %p366_p4, %p365_p3 }
  0x1b   : > { %p369_p8 = por %p368_p7, %p367_p5 }
  0x1d   : > { %p370_p9 = pnand %p369_p8, %p363_p2 }
  0x1f   : > { %373 = shalt.err (!%p370_p9)
}
  0x20   : > { %s374_s17 = scalar_lea.vmem %s548_s30, 1024  ;;  %s457_s19 = smov [#allocation2]  }
  0x21   : > { %p375_p13 = scmp.ne.s32.totalorder %s548_s30, %s374_s17  ;;  %s379_s23 = sshll.u32 %s457_s19, 4  ;;  %s380_s23 = int_to_ptr.vmem [resolvable:$false] %s379_s23 }
  0x22   : > { %s381_s24 = scalar_lea.vmem %s380_s23, 2048  ;;  %p382_p10 = scmp.lt.s32.totalorder %s548_s30, %s380_s23 }
  0x23   : > { %p377_p1 = pnand %p375_p13, %p361_p0  ;;  %p383_p3 = scmp.lt.s32.totalorder %s381_s24, %s374_s17 }
  0x25   : > { %p378_p11 = pneg %p377_p1  ;;  %p384_p4 = por %p383_p3, %p382_p10 }
  0x27   : > { %p385_p5 = pnand %p384_p4, %p378_p11 }
  0x29   : > { %388 = shalt.err (!%p385_p5)
}
  0x2a   : > { %s458_s25 = smov 256   ;;  %s459_s26 = smov 16  }
  0x2b   : > { %316 = dma.hbm_to_vmem [thread:$0]  (!%p544_p12), %s540_s28, 1024, %s548_s30, %s550_s4, %s458_s25, %s458_s25, %s459_s26  }
  0x2c   : > { %p296_p0 = scmp.ge.s32.totalorder %s455_s12, 1  ;;  %p132_p2 = scmp.lt.s32.totalorder %s455_s12, 9 }
  0x2e   : > { %p133_p7 = pnand %p296_p0, %p132_p2 }
  0x2f   : > { %s581_s27 = sand.u32 (!%p133_p7), 1, %s447_s10  }
  0x30   : > { %136 = sbr.rel (%p133_p7) target bundleno = 84 (0x54), region = 28  ;;  %s297_s29 = sshll.u32 (!%p133_p7), %s581_s27, 6 }
  0x31   : > { %s139_s5 = scalar_lea.sflag (!%p133_p7), [#allocation3], %s581_s27  ;;  %s142_s6 = scalar_lea.vmem (!%p133_p7), [#allocation2], %s297_s29 }
  0x37   : > { %434 = dma.done.wait (%p521_p6), %s139_s5, 1024  }
  0x38   : > { %436 = vsyncadd (%p521_p6), %s139_s5, 4294966272  ;;  %v175_v0 = vlaneseq  ;;  %v165_v4 = vld [vmem:[%s142_s6] sm:$0xff]  ;;  %s162_s3 = scalar_lea.vmem [#allocation5], %s297_s29  ;;  %v166_v6 = vld [vmem:[%s142_s6 + $0x8] sm:$0xff]  ;;  %s308_s7 = sshll.u32 %s499_s13, 10 }
  0x39   : > { %v173_v5 = vld [vmem:[%s642_s1] sm:$0x3]  ;;  %s216_s4 = sshll.u32 %s162_s3, 4  ;;  %v167_v9 = vld [vmem:[%s142_s6 + $0x10] sm:$0xff]  ;;  %v168_v10 = vld [vmem:[%s142_s6 + $0x18] sm:$0xff]  ;;  %s598_s13 = scalar_lea.hbm %s643_s2, %s308_s7  ;;  %s593_s4 = int_to_ptr.vmem [resolvable:$true] %s216_s4 }
  0x3a   : > { %v176_v1 = vshrl.u32 %v175_v0, 7  ;;  %v169_v11 = vld [vmem:[%s142_s6 + $0x20] sm:$0xff]  ;;  %v170_v12 = vld [vmem:[%s142_s6 + $0x28] sm:$0xff]  ;;  %v171_v13 = vld [vmem:[%s142_s6 + $0x30] sm:$0xff]  ;;  %s202_s14 = scalar_lea.sflag [#allocation4], %s581_s27  ;;  %s389_s16 = scalar_lea.vmem %s593_s4, 1024 }
  0x3b   : > { %v172_v14 = vld [vmem:[%s142_s6 + $0x38] sm:$0xff]  ;;  %p390_p6 = scmp.ne.s32.totalorder %s593_s4, %s389_s16  ;;  %p650_p10 = scmp.ne.s32.totalorder %s647_s21, 0 }
  0x3c   : > { %v177_v2 = vsub.s32 0, %v176_v1  ;;  %v181_v3 = vsub.s32 1, %v176_v1  ;;  %s460_s17 = smov [#allocation5]  }
  0x3d   : > { %p391_p11 = pnand %p390_p6, %p650_p10  ;;  %s393_s19 = sshll.u32 %s460_s17, 4  ;;  %s394_s19 = int_to_ptr.vmem [resolvable:$false] %s393_s19 }
  0x3e   : > { %v178_v7 = vrot.slane %v173_v5, %v177_v2  ;;  %v182_v8 = vrot.slane %v173_v5, %v181_v3  ;;  %s395_s23 = scalar_lea.vmem %s394_s19, 2048  ;;  %p396_p8 = scmp.lt.s32.totalorder %s593_s4, %s394_s19 }
  0x3f   : > { %p392_p12 = pneg %p391_p11  ;;  %p397_p9 = scmp.lt.s32.totalorder %s395_s23, %s389_s16 }
  0x40   : > { %v185_v15 = vmul.f32 %v178_v7, %v165_v4  ;;  %v186_v16 = vmul.f32 %v182_v8, %v166_v6  ;;  %v187_v17 = vmul.f32 %v178_v7, %v167_v9  ;;  %v188_v18 = vmul.f32 %v182_v8, %v168_v10 }
  0x41   : > { %v189_v19 = vmul.f32 %v178_v7, %v169_v11  ;;  %v190_v20 = vmul.f32 %v182_v8, %v170_v12  ;;  %v191_v21 = vmul.f32 %v178_v7, %v171_v13  ;;  %v192_v22 = vmul.f32 %v182_v8, %v172_v14  ;;  %p398_p13 = por %p397_p9, %p396_p8 }
  0x42   : > { %193 = vst [vmem:[%s162_s3] sm:$0xff] %v185_v15  ;;  %194 = vst [vmem:[%s162_s3 + $0x8] sm:$0xff] %v186_v16 }
  0x43   : > { %195 = vst [vmem:[%s162_s3 + $0x10] sm:$0xff] %v187_v17  ;;  %196 = vst [vmem:[%s162_s3 + $0x18] sm:$0xff] %v188_v18  ;;  %p399_p1 = pnand %p398_p13, %p392_p12 }
  0x44   : > { %197 = vst [vmem:[%s162_s3 + $0x20] sm:$0xff] %v189_v19  ;;  %198 = vst [vmem:[%s162_s3 + $0x28] sm:$0xff] %v190_v20 }
  0x45   : > { %199 = vst [vmem:[%s162_s3 + $0x30] sm:$0xff] %v191_v21  ;;  %200 = vst [vmem:[%s162_s3 + $0x38] sm:$0xff] %v192_v22 }
  0x46   : > { %402 = shalt.err (!%p399_p1)
}
  0x47   : > { %s403_s24 = scalar_lea.hbm %s598_s13, 1024  ;;  %s407_s29 = scalar_lea.hbm %s643_s2, 8192 }
  0x48   : > { %p404_p3 = scmp.ne.s32.totalorder %s598_s13, %s403_s24  ;;  %p408_p0 = scmp.lt.u32.totalorder %s598_s13, %s643_s2 }
  0x49   : > { %p409_p2 = scmp.lt.u32.totalorder %s407_s29, %s403_s24  ;;  %p411_p6 = scmp.lt.u32.totalorder %s403_s24, %s598_s13 }
  0x4a   : > { %p405_p4 = pnand %p404_p3, %p650_p10 }
  0x4b   : > { %p410_p7 = por %p409_p2, %p408_p0 }
  0x4c   : > { %p406_p5 = pneg %p405_p4 }
  0x4d   : > { %p412_p11 = por %p411_p6, %p410_p7 }
  0x4f   : > { %p413_p12 = pnand %p412_p11, %p406_p5 }
  0x51   : > { %416 = shalt.err (!%p413_p12)
}
  0x52   : > { %s461_s28 = smov 256   ;;  %s462_s30 = smov 16  }
  0x53   : > { %311 = dma.vmem_to_hbm [thread:$0]  (%p650_p10), %s593_s4, 1024, %s598_s13, %s202_s14, %s461_s28, %s461_s28, %s462_s30  }
  0x54 PF: > { %p322_p8 = scmp.ge.s32.totalorder %s455_s12, 2  ;;  %s231_s3 = sand.u32 1, %s443_s9  }
  0x55   : > { %p651_p9 = scmp.ne.s32.totalorder %s648_s22, 0  ;;  %s232_s7 = scalar_lea.sflag [#allocation4], %s231_s3 }
  0x57   : > { %p318_p13 = pnand %p322_p8, %p651_p9 }
  0x59   : > { %438 = dma.done.wait (!%p318_p13), %s232_s7, 1024  }
  0x5a   : > { %440 = vsyncadd (!%p318_p13), %s232_s7, 4294966272  ;;  %p15_p1 = scmp.ge.s32.totalorder %s503_s15, 10   ;;  %s652_s9 = smov %s447_s10 }
  0x5b   : > { %s653_s10 = smov %s451_s11  ;;  %s654_s11 = smov %s515_s18 }
  0x5c   : > { %s655_s12 = smov %s503_s15  ;;  %17 = sbr.rel (!%p15_p1) target bundleno = 5 (0x5), region = 73 }
  0x63   :  { %237 = vsyncpa [#allocation3], 1 }
  0x64   :  { %239 = vsyncpa [#allocation3 + $0x1], 1 }
  0x65   :  { %240 = vsyncpa [#allocation4], 1 }
  0x66   :  { %242 = vsyncpa [#allocation4 + $0x1], 1 }

</bundles_post_ra>
